<compile_context>
chip_gen: v5e
topology: v5e:2x2
jax: 0.10.0
libtpu: 0.0.40
codegen_flags: <defaults>
</compile_context>

<pallas_src>
import functools

import jax
import jax.numpy as jnp
from jax.experimental import pallas as pl
from jax.experimental.pallas import tpu as pltpu

_LN_EPS = 1e-5  # torch.nn.LayerNorm default


def sublayer_kernel(x_ref, r_ref, gamma_ref, beta_ref, o_ref, *, hidden):
    """One row-tile of LayerNorm(x + result) with affine (gamma, beta).

    Single pass over the f32 residual z: sum and sum-of-squares computed together,
    var = E[z^2] - mean^2 (clamped at 0).  All stats/math in f32 regardless of I/O
    dtype (v5e has no bf16 VPU/EUP).
    """
    z = x_ref[...].astype(jnp.float32) + r_ref[...].astype(jnp.float32)   # [tm, H]

    inv_h = 1.0 / float(hidden)
    s1 = jnp.sum(z, axis=-1, keepdims=True)            # [tm, 1]
    s2 = jnp.sum(z * z, axis=-1, keepdims=True)        # [tm, 1]
    mean = s1 * inv_h
    var = jnp.maximum(s2 * inv_h - mean * mean, 0.0)   # clamp guards f32 cancellation
    inv = jax.lax.rsqrt(var + _LN_EPS)

    # gamma/beta arrive as [1, H] blocks; implicit broadcast against [tm, H]
    # (no jnp.broadcast_to in the body).
    out = (z - mean) * inv * gamma_ref[...].astype(jnp.float32) \
          + beta_ref[...].astype(jnp.float32)
    o_ref[...] = out.astype(o_ref.dtype)


def _sublane_packing(dtype) -> int:
    """Rows per packed sublane group: f32 -> 8, bf16/f16 -> 16, int8/fp8 -> 32."""
    return max(8, 32 // jnp.dtype(dtype).itemsize)


def _vmem_limit_bytes() -> int:
    """Generation-aware VMEM budget (v5e/v6e: 128 MiB physical, v7x: 64 MiB)."""
    phys = 128 * 1024 * 1024
    try:
        phys = int(pltpu.get_tpu_info().vmem_capacity_bytes)
    except Exception:
        pass
    # -> 64 MiB on v5e/v6e, 48 MiB on v7x; leaves headroom for Mosaic scratch/DMA.
    return min(64 * 1024 * 1024, (phys * 3) // 4)


def _pick_row_tile(n_rows, hidden, itemsize, vmem_limit, packing) -> int:
    """Byte-aware row-tile size for a pure HBM-bandwidth-bound kernel."""
    if n_rows <= packing:
        return n_rows                               # full-extent block (always legal)

    budget = (vmem_limit * 3) // 5                  # ~60% of the limit for blocks
    # 3 I/O arrays x 2 pipeline buffers, plus ~3 f32 [tm, H] temporaries (z, z^2, out).
    per_row = 3 * 2 * hidden * itemsize + 3 * hidden * 4
    tm = budget // per_row
    tm = min(tm, 1024)                              # HBM roofline saturates ~512-1024 rows
    tm = min(tm, n_rows)
    tm = max(packing, (tm // packing) * packing)    # align to sublane packing

    # Guarantee >= 2 grid steps when possible so dimension_semantics=("parallel",)
    # can shard rows across both TensorCores on v7x; harmless on 1-TC v5e/v6e.
    if tm >= n_rows:
        half = -(-n_rows // 2)
        half = -(-half // packing) * packing
        if half < n_rows:
            tm = half
    return tm


def sublayer(x, result, gamma, beta):
    """x, result: [..., H] -> [..., H].  LayerNorm(x + result); dropout is identity."""
    # TODO(synk): training-mode dropout (Bernoulli mask with p=config.dropout_proba)
    # not implemented; this matches the eval/inference forward pass.
    assert x.shape == result.shape
    orig_shape = x.shape
    H = orig_shape[-1]
    N = 1
    for d in orig_shape[:-1]:
        N *= d

    x2 = x.reshape(N, H)
    r2 = result.reshape(N, H)
    g2 = gamma.reshape(1, H)
    b2 = beta.reshape(1, H)

    itemsize = jnp.dtype(x.dtype).itemsize
    packing = _sublane_packing(x.dtype)
    vmem_limit = _vmem_limit_bytes()
    tm = _pick_row_tile(N, H, itemsize, vmem_limit, packing)
    grid = (pl.cdiv(N, tm),)

    # NOTE: in production H should be a multiple of 128 for lane-dense stores.
    # We deliberately do NOT pad H in the wrapper: jnp.pad/slice would add whole
    # extra HBM passes over x/result/out, costing more than masked partial stores
    # for this bandwidth-bound op.
    # TODO(synk): for very large H (>= ~8K) add an H-chunked accumulation pass so
    # per-step VMEM stays bounded independent of H.

    cost = pl.CostEstimate(
        flops=10 * N * H,
        transcendentals=N,
        bytes_accessed=3 * N * H * itemsize + 2 * H * 4,
    )

    out2 = pl.pallas_call(
        functools.partial(sublayer_kernel, hidden=H),
        out_shape=jax.ShapeDtypeStruct((N, H), x.dtype),
        grid_spec=pltpu.PrefetchScalarGridSpec(
            num_scalar_prefetch=0,
            grid=grid,
            in_specs=[
                pl.BlockSpec((tm, H), lambda i: (i, 0)),   # x row-tile
                pl.BlockSpec((tm, H), lambda i: (i, 0)),   # result row-tile
                pl.BlockSpec((1, H), lambda i: (0, 0)),    # gamma (constant index)
                pl.BlockSpec((1, H), lambda i: (0, 0)),    # beta  (constant index)
            ],
            out_specs=pl.BlockSpec((tm, H), lambda i: (i, 0)),
        ),
        compiler_params=pltpu.CompilerParams(
            dimension_semantics=("parallel",),
            vmem_limit_bytes=vmem_limit,
        ),
        cost_estimate=cost,
    )(x2, r2, g2, b2)

    return out2.reshape(orig_shape)


def reference(x, result, gamma, beta):
    z = x + result
    mean = jnp.mean(z, axis=-1, keepdims=True)
    var = jnp.mean(jnp.square(z - mean), axis=-1, keepdims=True)
    return (z - mean) / jnp.sqrt(var + _LN_EPS) * gamma + beta


if __name__ == "__main__":
    # Small shapes consistent with the module: batch=2, seq=8, hidden=32.
    B, S, H = 2, 8, 32
    key = jax.random.PRNGKey(0)
    k1, k2, k3, k4 = jax.random.split(key, 4)

    x = jax.random.normal(k1, (B, S, H), dtype=jnp.float32)
    result = jax.random.normal(k2, (B, S, H), dtype=jnp.float32)
    gamma = 1.0 + 0.1 * jax.random.normal(k3, (H,), dtype=jnp.float32)
    beta = 0.01 * jax.random.normal(k4, (H,), dtype=jnp.float32)

    out = sublayer(x, result, gamma, beta)
    out = jax.block_until_ready(out)

    ref = reference(x, result, gamma, beta)
    assert out.shape == (B, S, H)
    assert jnp.allclose(out, ref, atol=1e-4, rtol=1e-4), "mismatch vs reference"

    print("KERNEL_OK")
</pallas_src>

<mosaic_0001>
module attributes {stable_mosaic.version = 11 : i64} {
  func.func @sublayer_kernel(%arg0: i32, %arg1: memref<8x32xf32, #tpu.memory_space<vmem>>, %arg2: memref<8x32xf32, #tpu.memory_space<vmem>>, %arg3: memref<1x32xf32, #tpu.memory_space<vmem>>, %arg4: memref<1x32xf32, #tpu.memory_space<vmem>>, %arg5: memref<8x32xf32, #tpu.memory_space<vmem>>) attributes {dimension_semantics = [#tpu.dimension_semantics<parallel>], iteration_bounds = array<i64: 2>, scalar_prefetch = 0 : i64, scratch_operands = 0 : i64, tpu.core_type = #tpu.core_type<tc>, window_params = [{transform_indices = @transform_0, window_bounds = array<i64: 8, 32>}, {transform_indices = @transform_1, window_bounds = array<i64: 8, 32>}, {pipeline_mode = #tpu.pipeline_mode<synchronous>, transform_indices = @transform_2, window_bounds = array<i64: 1, 32>}, {pipeline_mode = #tpu.pipeline_mode<synchronous>, transform_indices = @transform_3, window_bounds = array<i64: 1, 32>}, {transform_indices = @transform_4, window_bounds = array<i64: 8, 32>}]} {
    %c0 = arith.constant 0 : index
    %c0_0 = arith.constant 0 : index
    %0 = vector.load %arg1[%c0, %c0_0] : memref<8x32xf32, #tpu.memory_space<vmem>>, vector<8x32xf32>
    %c0_1 = arith.constant 0 : index
    %c0_2 = arith.constant 0 : index
    %1 = vector.load %arg2[%c0_1, %c0_2] : memref<8x32xf32, #tpu.memory_space<vmem>>, vector<8x32xf32>
    %2 = arith.addf %0, %1 : vector<8x32xf32>
    %cst = arith.constant dense<0.000000e+00> : vector<8xf32>
    %3 = vector.multi_reduction <add>, %2, %cst [1] : vector<8x32xf32> to vector<8xf32>
    %4 = vector.shape_cast %3 : vector<8xf32> to vector<8x1xf32>
    %5 = arith.mulf %2, %2 : vector<8x32xf32>
    %cst_3 = arith.constant dense<0.000000e+00> : vector<8xf32>
    %6 = vector.multi_reduction <add>, %5, %cst_3 [1] : vector<8x32xf32> to vector<8xf32>
    %7 = vector.shape_cast %6 : vector<8xf32> to vector<8x1xf32>
    %cst_4 = arith.constant 3.125000e-02 : f32
    %8 = vector.broadcast %cst_4 : f32 to vector<8x1xf32>
    %9 = arith.mulf %4, %8 : vector<8x1xf32>
    %cst_5 = arith.constant 3.125000e-02 : f32
    %10 = vector.broadcast %cst_5 : f32 to vector<8x1xf32>
    %11 = arith.mulf %7, %10 : vector<8x1xf32>
    %12 = arith.mulf %9, %9 : vector<8x1xf32>
    %13 = arith.subf %11, %12 : vector<8x1xf32>
    %cst_6 = arith.constant 0.000000e+00 : f32
    %14 = vector.broadcast %cst_6 : f32 to vector<8x1xf32>
    %15 = arith.maximumf %13, %14 : vector<8x1xf32>
    %cst_7 = arith.constant 9.99999974E-6 : f32
    %16 = vector.broadcast %cst_7 : f32 to vector<8x1xf32>
    %17 = arith.addf %15, %16 : vector<8x1xf32>
    %18 = math.rsqrt %17 : vector<8x1xf32>
    %19 = vector.broadcast %9 : vector<8x1xf32> to vector<8x32xf32>
    %20 = arith.subf %2, %19 : vector<8x32xf32>
    %21 = vector.broadcast %18 : vector<8x1xf32> to vector<8x32xf32>
    %22 = arith.mulf %20, %21 : vector<8x32xf32>
    %c0_8 = arith.constant 0 : index
    %c0_9 = arith.constant 0 : index
    %23 = vector.load %arg3[%c0_8, %c0_9] : memref<1x32xf32, #tpu.memory_space<vmem>>, vector<1x32xf32>
    %24 = vector.broadcast %23 : vector<1x32xf32> to vector<8x32xf32>
    %25 = arith.mulf %22, %24 : vector<8x32xf32>
    %c0_10 = arith.constant 0 : index
    %c0_11 = arith.constant 0 : index
    %26 = vector.load %arg4[%c0_10, %c0_11] : memref<1x32xf32, #tpu.memory_space<vmem>>, vector<1x32xf32>
    %27 = vector.broadcast %26 : vector<1x32xf32> to vector<8x32xf32>
    %28 = arith.addf %25, %27 : vector<8x32xf32>
    %c0_12 = arith.constant 0 : index
    %c0_13 = arith.constant 0 : index
    %29 = vector.load %arg5[%c0_12, %c0_13] : memref<8x32xf32, #tpu.memory_space<vmem>>, vector<8x32xf32>
    tpu.vector_store %arg5[%c0_12, %c0_13], %28 {strides = array<i32>} : memref<8x32xf32, #tpu.memory_space<vmem>>, vector<8x32xf32>,
    return
  }
  func.func @transform_0(%arg0: i32) -> (i32, i32) {
    %c0_i32 = arith.constant 0 : i32
    %c0_i32_0 = arith.constant 0 : i32
    return %arg0, %c0_i32 : i32, i32
  }
  func.func @transform_1(%arg0: i32) -> (i32, i32) {
    %c0_i32 = arith.constant 0 : i32
    %c0_i32_0 = arith.constant 0 : i32
    return %arg0, %c0_i32 : i32, i32
  }
  func.func @transform_2(%arg0: i32) -> (i32, i32) {
    %c0_i32 = arith.constant 0 : i32
    %c0_i32_0 = arith.constant 0 : i32
    %c0_i32_1 = arith.constant 0 : i32
    return %c0_i32, %c0_i32_0 : i32, i32
  }
  func.func @transform_3(%arg0: i32) -> (i32, i32) {
    %c0_i32 = arith.constant 0 : i32
    %c0_i32_0 = arith.constant 0 : i32
    %c0_i32_1 = arith.constant 0 : i32
    return %c0_i32, %c0_i32_0 : i32, i32
  }
  func.func @transform_4(%arg0: i32) -> (i32, i32) {
    %c0_i32 = arith.constant 0 : i32
    %c0_i32_0 = arith.constant 0 : i32
    return %arg0, %c0_i32 : i32, i32
  }
}

</mosaic_0001>

<bundles_post_ra>
// kernel: tpu_custom_call.1
= control target key start
LH: loop header
LB: loop body
LE: loop exit
PB: predicated region body
PF: predicated region fallthrough
CT: control target
= control target key end

     0   :  { %s804_s0 = inlined_call_operand.hbm [shape: f32[16,32], index: 0, kind: input, shape index: {}]   ;;  %s805_s1 = inlined_call_operand.hbm [shape: f32[16,32], index: 1, kind: input, shape index: {}]   ;;  %s806_s2 = inlined_call_operand.vmem [shape: f32[1,32], index: 2, kind: input, shape index: {}]   ;;  %s807_s3 = inlined_call_operand.vmem [shape: f32[1,32], index: 3, kind: input, shape index: {}]   ;;  %s808_s4 = inlined_call_operand.hbm [shape: f32[16,32], index: 4, kind: output, shape index: {}]  }
   0x1   :  { %809 = sst [smem:[#allocation11_spill]] %s804_s0 }
   0x2   :  { %9 = vsyncpa [#allocation3], 0 }
   0x3   :  { %11 = vsyncpa [#allocation3 + $0x1], 0 }
   0x4   :  { %12 = vsyncpa [#allocation6], 0 }
   0x5   :  { %14 = vsyncpa [#allocation6 + $0x1], 0 }
   0x6   :  { %15 = vsyncpa [#allocation4], 0 }
   0x7   :  { %17 = vsyncpa [#allocation4 + $0x1], 0  ;;  %s630_s15 = smov 0   ;;  %s632_s16 = smov 0  }
   0x8   :  { %s634_s17 = smov 0   ;;  %s636_s18 = smov 0  }
   0x9 LB: > { %s651_s19 = sadd.s32 4294967295, %s603_s18   ;;  %s403_s20 = sadd.s32 4294967294, %s603_s18   ;;  %s603_s18 = sphi %s636_s18, %s821_s18   ;;  %s599_s17 = sphi %s634_s17, %s820_s17   ;;  %s595_s16 = sphi %s632_s16, %s819_s16   ;;  %s591_s15 = sphi %s630_s15, %s818_s15  }
   0xa   : > { %s655_s21 = sadd.s32 1, %s603_s18   ;;  %s30_s22 = sadd.s32 1, %s599_s17 }
   0xb   : > { %s27_s23 = ssub.s32 %s603_s18, %s655_s21  ;;  %p37_p0 = scmp.ne.s32.totalorder %s599_s17, %s595_s16 }
   0xc   : > { %p28_p1 = scmp.eq.s32.totalorder %s27_s23, 0  ;;  %p38_p2 = scmp.eq.s32.totalorder %s603_s18, 0 }
   0xd   : > { %p43_p3 = scmp.ne.s32.totalorder %s595_s16, %s591_s15  ;;  %p44_p4 = scmp.eq.s32.totalorder %s651_s19, 0 }
   0xe   : > { %s667_s24 = scalar_select %p28_p1, %s599_s17, %s30_s22  }
   0xf   : > { %p669_p5 = por %p38_p2, %p37_p0  ;;  %p673_p6 = por %p44_p4, %p43_p3 }
  0x10   : > { %p135_p7 = scmp.eq.s32.totalorder %s651_s19, 1  ;;  %p141_p8 = scmp.eq.s32.totalorder %s403_s20, 1 }
  0x11   : > { %p435_p10 = scmp.lt.s32.totalorder %s603_s18, 2  ;;  %s689_s29 = sand.u32 1, %s599_s17  }
  0x12   : > { %p680_p11 = por %p135_p7, %p37_p0  ;;  %p684_p12 = por %p141_p8, %p43_p3 }
  0x13   : > { %s407_s30 = sshll.u32 %s603_s18, 3  ;;  %s406_s5 = sshll.u32 %s689_s29, 3 }
  0x14   : > { %s814_s0 = sld [smem:[#allocation11_spill]]  ;;  %s171_s10 = scalar_lea.vmem [#allocation2], %s406_s5 }
  0x15   : > { %s179_s11 = sshll.u32 %s171_s10, 4  ;;  %p698_p13 = pnand %p435_p10, %p669_p5  ;;  %s180_s11 = int_to_ptr.vmem [resolvable:$true] %s179_s11 }
  0x16   : > { %p410_p0 = scmp.ge.s32.totalorder %s603_s18, 1  ;;  %p203_p1 = scmp.lt.s32.totalorder %s603_s18, 3 }
  0x17   : > { %s168_s13 = scalar_lea.sflag [#allocation3], %s689_s29  ;;  %p477_p3 = pneg %p698_p13 }
  0x1a   : > { %s175_s8 = scalar_lea.hbm %s814_s0, %s407_s30  ;;  %s480_s25 = scalar_lea.hbm %s814_s0, 16 }
  0x1b   : > { %s177_s9 = sshll.u32 %s175_s8, 4  ;;  %s178_s9 = int_to_ptr.hbm [resolvable:$true] %s177_s9 }
  0x1c   : > { %s473_s14 = sshra.s32 %s178_s9, 4  ;;  %s474_s14 = int_to_ptr.hbm [resolvable:$true] %s473_s14 }
  0x1d   : > { %s475_s20 = scalar_lea.hbm %s474_s14, 8  ;;  %p481_p5 = scmp.lt.s32.totalorder %s474_s14, %s814_s0 }
  0x1e   : > { %p476_p2 = scmp.ne.s32.totalorder %s474_s14, %s475_s20  ;;  %p482_p8 = scmp.lt.s32.totalorder %s480_s25, %s475_s20 }
  0x20   : > { %p478_p4 = pnand %p477_p3, %p476_p2  ;;  %p483_p10 = por %p482_p8, %p481_p5 }
  0x22   : > { %p479_p7 = pneg %p478_p4 }
  0x24   : > { %p484_p9 = pnand %p483_p10, %p479_p7 }
  0x26   : > { %487 = shalt.err (!%p484_p9)
}
  0x27   : > { %427 = dma.hbm_to_vmem [thread:$0]  (!%p698_p13), %s178_s9, 128, %s180_s11, %s168_s13  }
  0x28   : > { %p722_p2 = pnand %p410_p0, %p203_p1  ;;  %s194_s14 = scalar_lea.hbm %s805_s1, %s407_s30 }
  0x29   : > { %s196_s20 = sshll.u32 %s194_s14, 4  ;;  %s190_s23 = scalar_lea.vmem [#allocation5], %s406_s5  ;;  %s197_s20 = int_to_ptr.hbm [resolvable:$true] %s196_s20 }
  0x2a   : > { %s198_s25 = sshll.u32 %s190_s23, 4  ;;  %s187_s6 = scalar_lea.sflag [#allocation6], %s689_s29  ;;  %s199_s25 = int_to_ptr.vmem [resolvable:$true] %s198_s25 }
  0x2b   : > { %s503_s7 = sshra.s32 %s197_s20, 4  ;;  %s510_s13 = scalar_lea.hbm %s805_s1, 16  ;;  %s504_s7 = int_to_ptr.hbm [resolvable:$true] %s503_s7 }
  0x2c   : > { %s505_s0 = scalar_lea.hbm %s504_s7, 8  ;;  %p511_p4 = scmp.lt.s32.totalorder %s504_s7, %s805_s1 }
  0x2d   : > { %p506_p9 = scmp.ne.s32.totalorder %s504_s7, %s505_s0  ;;  %p512_p7 = scmp.lt.s32.totalorder %s510_s13, %s505_s0 }
  0x2f   : > { %p508_p0 = pnand %p506_p9, %p477_p3  ;;  %p513_p5 = por %p512_p7, %p511_p4 }
  0x31   : > { %p509_p1 = pneg %p508_p0 }
  0x33   : > { %p514_p8 = pnand %p513_p5, %p509_p1 }
  0x35   : > { %517 = shalt.err (!%p514_p8)
}
  0x36   : > { %430 = dma.hbm_to_vmem [thread:$0]  (!%p698_p13), %s197_s20, 128, %s199_s25, %s187_s6  }
  0x37   : > { %207 = sbr.rel (%p722_p2) target bundleno = 226 (0xe2), region = 36  ;;  %s744_s29 = sand.u32 (!%p722_p2), 1, %s595_s16  }
  0x38   : > { %s747_s5 = sshll.u32 (!%p722_p2), %s744_s29, 3  ;;  %s210_s22 = scalar_lea.sflag (!%p722_p2), [#allocation3], %s744_s29 }
  0x39   : > { %s213_s0 = scalar_lea.vmem (!%p722_p2), [#allocation2], %s747_s5 }
  0x3c   : > { %578 = dma.done.wait (%p673_p6), %s210_s22, 128  }
  0x3d   : > { %580 = vsyncadd (%p673_p6), %s210_s22, 4294967168  ;;  %s220_s12 = scalar_lea.sflag [#allocation6], %s744_s29  ;;  %s223_s8 = scalar_lea.vmem [#allocation5], %s747_s5 }
  0x3e   : > { %582 = dma.done.wait (%p673_p6), %s220_s12, 128  }
  0x3f   : > { %584 = vsyncadd (%p673_p6), %s220_s12, 4294967168  ;;  %v254_v0 = vld [vmem:[%s213_s0] sm:$0xff]  ;;  %v255_v1 = vld [vmem:[%s223_s8] sm:$0xff]  ;;  %vm257_vm0 = vcmask 261120   ;;  %s415_s26 = sshll.u32 %s651_s19, 3  ;;  %s253_s19 = scalar_lea.vmem [#allocation7], %s747_s5 }
  0x40   : > { %v256_v2 = vadd.f32 %v255_v1, %v254_v0  ;;  %v469_v21 = vld [vmem:[%s806_s2] ss:$0 sm:$0xff]  ;;  %s305_s6 = scalar_lea.hbm %s808_s4, %s415_s26  ;;  %s307_s11 = sshll.u32 %s253_s19, 4  ;;  %s308_s11 = int_to_ptr.vmem [resolvable:$true] %s307_s11 }
  0x41   : > { %v470_v24 = vld [vmem:[%s807_s3] ss:$0 sm:$0xff]  ;;  %s309_s13 = sshll.u32 %s305_s6, 4  ;;  %s295_s10 = scalar_lea.sflag [#allocation4], %s744_s29  ;;  %s310_s13 = int_to_ptr.hbm [resolvable:$true] %s309_s13 }
  0x42   : > { %v258_v3 = vsel %vm257_vm0, %v256_v2, 0.0  ;;  %v261_v4 = vmul.f32 %v256_v2, %v256_v2  ;;  %s547_s30 = sshra.s32 %s310_s13, 4  ;;  %s553_s5 = scalar_lea.hbm %s808_s4, 16  ;;  %s548_s30 = int_to_ptr.hbm [resolvable:$true] %s547_s30 }
  0x43   : > { %259 = vadd.xlane.f32.xlu0 %v258_v3  ;;  %s549_s22 = scalar_lea.hbm %s548_s30, 8  ;;  %p554_p10 = scmp.lt.s32.totalorder %s548_s30, %s808_s4 }
  0x44   : > { %v262_v5 = vsel %vm257_vm0, %v261_v4, 0.0  ;;  %p550_p6 = scmp.ne.s32.totalorder %s548_s30, %s549_s22  ;;  %p555_p2 = scmp.lt.s32.totalorder %s553_s5, %s549_s22 }
  0x46   : > { %p551_p13 = pnand %p550_p6, %p680_p11  ;;  %p556_p9 = por %p555_p2, %p554_p10 }
  0x48   : > { %p552_p3 = pneg %p551_p13 }
  0x4a   : > { %p557_p0 = pnand %p556_p9, %p552_p3 }
  0x4b   : > { %263 = vadd.xlane.f32.xlu0 %v262_v5 }
  0xb6   : > { %v260_v6 = vpop.xlane.xlu0 %259 }
  0xb7   : > { %v265_v7 = vmul.f32 0.03125, %v260_v6 }
  0xb9   : > { %v267_v9 = vmul.f32 %v265_v7, %v265_v7  ;;  %v281_v20 = vsub.f32 %v256_v2, %v265_v7 }
  0xbe   : > { %v264_v8 = vpop.xlane.xlu0 %263 }
  0xbf   : > { %v266_v10 = vmul.f32 0.03125, %v264_v8 }
  0xc1   : > { %v268_v11 = vsub.f32 %v266_v10, %v267_v9 }
  0xc3   : > { %v269_v12 = vmax.f32 %v268_v11, 0.0 }
  0xc5   : > { %v270_v13 = vadd.f32 1e-05, %v269_v12 }
  0xc7   : > { %471 = vrsqrt.f32 %v270_v13  ;;  %vm277_vm2 = vweird.f32 %v270_v13 }
  0xcd   : > { %v472_v14 = vpop.eup %471 }
  0xce   : > { %v272_v15 = vmul.f32 %v472_v14, %v270_v13  ;;  %vm278_vm1 = vweird.f32 %v472_v14 }
  0xcf   : > { %vm279_vm3 = vmor %vm277_vm2, %vm278_vm1 }
  0xd0   : > { %v273_v16 = vmul.f32 %v472_v14, %v272_v15 }
  0xd2   : > { %v274_v17 = vmul.f32 0.5, %v273_v16 }
  0xd4   : > { %v275_v18 = vsub.f32 1.5, %v274_v17 }
  0xd6   : > { %v276_v19 = vmul.f32 %v472_v14, %v275_v18 }
  0xd8   : > { %v280_v22 = vsel %vm279_vm3, %v472_v14, %v276_v19 }
  0xd9   : > { %v282_v23 = vmul.f32 %v281_v20, %v280_v22 }
  0xdb   : > { %v287_v25 = vmul.f32 %v469_v21, %v282_v23 }
  0xdd   : > { %v292_v26 = vadd.f32 %v470_v24, %v287_v25 }
  0xdf   : > { %293 = vst.msk [vmem:[%s253_s19] sm:$0xff] %vm257_vm0, %v292_v26 }
  0xe0   : > { %560 = shalt.err (!%p557_p0)
}
  0xe1   : > { %422 = dma.vmem_to_hbm [thread:$0]  (%p680_p11), %s308_s11, 128, %s310_s13, %s295_s10  }
  0xe2 PF: > { %s321_s29 = sand.u32 1, %s591_s15   ;;  %p817_p1 = scmp.ge.s32.totalorder %s603_s18, 2 }
  0xe3   : > { %s322_s14 = scalar_lea.sflag [#allocation4], %s321_s29 }
  0xe4   : > { %p432_p4 = pnand %p817_p1, %p684_p12 }
  0xe6   : > { %p433_p7 = pneg %p432_p4 }
  0xe8   : > { %586 = dma.done.wait (%p433_p7), %s322_s14, 128  }
  0xe9   : > { %588 = vsyncadd (%p433_p7), %s322_s14, 4294967168  ;;  %p20_p5 = scmp.ge.s32.totalorder %s655_s21, 4   ;;  %s818_s15 = smov %s595_s16 }
  0xea   : > { %s819_s16 = smov %s599_s17  ;;  %s820_s17 = smov %s667_s24 }
  0xeb   : > { %s821_s18 = smov %s655_s21  ;;  %22 = sbr.rel (!%p20_p5) target bundleno = 9 (0x9), region = 94 }
  0xf0   :  { %328 = vsyncpa [#allocation3], 1 }
  0xf1   :  { %330 = vsyncpa [#allocation3 + $0x1], 1 }
  0xf2   :  { %331 = vsyncpa [#allocation6], 1 }
  0xf3   :  { %333 = vsyncpa [#allocation6 + $0x1], 1 }
  0xf4   :  { %334 = vsyncpa [#allocation4], 1 }
  0xf5   :  { %336 = vsyncpa [#allocation4 + $0x1], 1 }

</bundles_post_ra>
